<compile_context>
chip_gen: v6e
topology: v6e:2x2x1
jax: 0.10.0
libtpu: 0.0.40
codegen_flags: <defaults>
</compile_context>

<pallas_src>
import jax
import jax.numpy as jnp
from jax.experimental import pallas as pl
from jax.experimental.pallas import tpu as pltpu


def _disc_kernel(xT_ref, lT_ref, w1xT_ref, w1lT_ref, b1_ref, w2_ref, b2_ref, o_ref):
    # xT_ref  : [2, TB]   lT_ref : [L, TB]        (batch on the lane axis)
    # w1xT_ref: [H, 2]    w1lT_ref: [H, L]        b1_ref: [H, 1]
    # w2_ref  : [1, H]    b2_ref : [1, 1] (SMEM scalar)
    # o_ref   : [1, TB]   lane-dense output tile
    #
    # Layer 1 == Linear(concat([x, label], 1)) without materializing the concat,
    # computed transposed so batch stays on lanes:  hT = W1x^T x^T + W1l^T lbl^T.
    hT = jnp.dot(w1xT_ref[...], xT_ref[...], preferred_element_type=jnp.float32)
    hT = hT + jnp.dot(w1lT_ref[...], lT_ref[...], preferred_element_type=jnp.float32)
    hT = jnp.maximum(hT + b1_ref[...], 0.0)                  # ReLU, [H, TB]

    # Layer 2: [1,H] @ [H,TB] -> [1,TB], already lane-dense, no relayout.
    z = jnp.dot(w2_ref[...], hT, preferred_element_type=jnp.float32) + b2_ref[0, 0]

    # Exact sigmoid with a single EUP transcendental: sigmoid(z) = 0.5*tanh(z/2) + 0.5
    o_ref[...] = 0.5 * jnp.tanh(0.5 * z) + 0.5


def _pick_batch_tiling(B, max_tile):
    """Return (TB, BP): lane-axis batch tile and (possibly padded) batch size."""
    if B <= max_tile:
        # Split into two 128-aligned halves when free, so v7x megacore uses both TCs.
        if B >= 512 and B % 256 == 0 and B // 2 <= max_tile:
            return B // 2, B
        return B, B                     # single full-extent tile: no 128 rule, no pad
    # Large batch: prefer a 128-multiple tile that divides B (no pad, no ragged tile).
    top = max_tile - max_tile % 128
    for cand in range(top, 127, -128):
        if B % cand == 0:
            return cand, B
    bp = (B + top - 1) // top * top     # last resort: pad up to a tile multiple
    return top, bp


def discriminator_forward(x, label_onehot, params, *, max_tile=4096):
    """x: [B, 2] f32, label_onehot: [B, L] f32 -> [B, 1] f32 (matches torch module)."""
    w1, b1, w2, b2 = params
    B = x.shape[0]
    L = label_onehot.shape[1]
    H = w1.shape[1]
    assert x.shape[1] == 2 and w1.shape[0] == 2 + L and w2.shape == (H, 1)

    # Batch-on-lanes layout.
    # TODO(synk): have the producer emit x^T / label^T directly to avoid this wrapper
    # transpose pass (kernel is already laid out for it).
    xT = x.T                       # [2, B]
    lT = label_onehot.T            # [L, B]

    TB, BP = _pick_batch_tiling(B, max_tile)
    if BP != B:                    # rare path; pad fuses with the transpose above
        xT = jnp.pad(xT, ((0, 0), (0, BP - B)))
        lT = jnp.pad(lT, ((0, 0), (0, BP - B)))
    num_tiles = BP // TB

    w1xT = w1[:2].T                # [H, 2]  input-feature rows of layer-1 weights
    w1lT = w1[2:].T                # [H, L]  label-onehot rows
    b1c = b1.reshape(H, 1)         # broadcasts over the lane (batch) axis
    w2row = w2.reshape(1, H)       # lane-dense row vector for layer 2
    b2s = b2.reshape(1, 1)         # scalar -> SMEM

    din = 2 + L
    cost = pl.CostEstimate(
        flops=2 * BP * H * (din + 1),
        transcendentals=BP,
        bytes_accessed=4 * (BP * (din + 1) + H * (din + 2) + 1),
    )

    out = pl.pallas_call(
        _disc_kernel,
        out_shape=jax.ShapeDtypeStruct((1, BP), jnp.float32),
        grid=(num_tiles,),
        in_specs=[
            pl.BlockSpec((2, TB), lambda i: (0, i)),
            pl.BlockSpec((L, TB), lambda i: (0, i)),
            pl.BlockSpec((H, 2), lambda i: (0, 0)),
            pl.BlockSpec((H, L), lambda i: (0, 0)),
            pl.BlockSpec((H, 1), lambda i: (0, 0)),
            pl.BlockSpec((1, H), lambda i: (0, 0)),
            pl.BlockSpec(memory_space=pltpu.MemorySpace.SMEM),
        ],
        out_specs=pl.BlockSpec((1, TB), lambda i: (0, i)),
        compiler_params=pltpu.CompilerParams(
            dimension_semantics=("parallel",)),
        cost_estimate=cost,
    )(xT, lT, w1xT, w1lT, b1c, w2row, b2s)

    # Lane-dense kernel output [1, BP] -> the module's [B, 1].
    return out[0, :B].reshape(B, 1)


def init_params(key, label_dim, hidden_dim):
    """Deterministic synthetic init (shapes match nn.Linear(2+L, H), nn.Linear(H, 1))."""
    in_dim = 2 + label_dim
    k1, k2, k3, k4 = jax.random.split(key, 4)
    w1 = jax.random.normal(k1, (in_dim, hidden_dim), jnp.float32) * 0.1
    b1 = jax.random.normal(k2, (hidden_dim,), jnp.float32) * 0.1
    w2 = jax.random.normal(k3, (hidden_dim, 1), jnp.float32) * 0.1
    b2 = jax.random.normal(k4, (1,), jnp.float32) * 0.1
    return (w1, b1, w2, b2)


def _reference_forward(x, label_onehot, params):
    w1, b1, w2, b2 = params
    xin = jnp.concatenate([x, label_onehot], axis=1)
    h = jnp.maximum(xin @ w1 + b1, 0.0)
    return jax.nn.sigmoid(h @ w2 + b2)


if __name__ == "__main__":
    label_dim = 2
    hidden_dim = 32
    batch = 8

    key = jax.random.PRNGKey(0)
    kx, kl, kp = jax.random.split(key, 3)

    x = jax.random.normal(kx, (batch, 2), jnp.float32)
    labels = jax.random.randint(kl, (batch,), 0, label_dim)
    label_onehot = jax.nn.one_hot(labels, label_dim, dtype=jnp.float32)

    params = init_params(kp, label_dim, hidden_dim)

    out = discriminator_forward(x, label_onehot, params)
    out = jax.block_until_ready(out)

    ref = _reference_forward(x, label_onehot, params)
    assert out.shape == (batch, 1)
    # Exact sigmoid (tanh form) -> tight tolerance restored.
    assert jnp.allclose(out, ref, atol=1e-5, rtol=1e-5)

    print("KERNEL_OK")
</pallas_src>

<mosaic_0001>
module attributes {stable_mosaic.version = 11 : i64} {
  func.func @_disc_kernel(%arg0: i32, %arg1: memref<2x8xf32, #tpu.memory_space<vmem>>, %arg2: memref<2x8xf32, #tpu.memory_space<vmem>>, %arg3: memref<32x2xf32, #tpu.memory_space<vmem>>, %arg4: memref<32x2xf32, #tpu.memory_space<vmem>>, %arg5: memref<32x1xf32, #tpu.memory_space<vmem>>, %arg6: memref<1x32xf32, #tpu.memory_space<vmem>>, %arg7: memref<1x1xf32, #tpu.memory_space<smem>>, %arg8: memref<1x8xf32, #tpu.memory_space<vmem>>) attributes {dimension_semantics = [#tpu.dimension_semantics<parallel>], iteration_bounds = array<i64: 1>, scalar_prefetch = 0 : i64, scratch_operands = 0 : i64, tpu.core_type = #tpu.core_type<tc>, window_params = [{transform_indices = @transform_0, window_bounds = array<i64: 2, 8>}, {transform_indices = @transform_1, window_bounds = array<i64: 2, 8>}, {pipeline_mode = #tpu.pipeline_mode<synchronous>, transform_indices = @transform_2, window_bounds = array<i64: 32, 2>}, {pipeline_mode = #tpu.pipeline_mode<synchronous>, transform_indices = @transform_3, window_bounds = array<i64: 32, 2>}, {pipeline_mode = #tpu.pipeline_mode<synchronous>, transform_indices = @transform_4, window_bounds = array<i64: 32, 1>}, {pipeline_mode = #tpu.pipeline_mode<synchronous>, transform_indices = @transform_5, window_bounds = array<i64: 1, 32>}, {transform_indices = @transform_6, window_bounds = array<i64: 1, 1>}, {transform_indices = @transform_7, window_bounds = array<i64: 1, 8>}]} {
    %c0 = arith.constant 0 : index
    %c0_0 = arith.constant 0 : index
    %0 = vector.load %arg3[%c0, %c0_0] : memref<32x2xf32, #tpu.memory_space<vmem>>, vector<32x2xf32>
    %c0_1 = arith.constant 0 : index
    %c0_2 = arith.constant 0 : index
    %1 = vector.load %arg1[%c0_1, %c0_2] : memref<2x8xf32, #tpu.memory_space<vmem>>, vector<2x8xf32>
    %cst = arith.constant dense<0.000000e+00> : vector<32x8xf32>
    %2 = tpu.matmul %0, %1, %cst {dimension_numbers = #tpu.dot_dimension_numbers<[1], [0], [0], [1], [0, 0, 1, 1], [], []>} : vector<32x2xf32>, vector<2x8xf32>, vector<32x8xf32> -> vector<32x8xf32>
    %c0_3 = arith.constant 0 : index
    %c0_4 = arith.constant 0 : index
    %3 = vector.load %arg4[%c0_3, %c0_4] : memref<32x2xf32, #tpu.memory_space<vmem>>, vector<32x2xf32>
    %c0_5 = arith.constant 0 : index
    %c0_6 = arith.constant 0 : index
    %4 = vector.load %arg2[%c0_5, %c0_6] : memref<2x8xf32, #tpu.memory_space<vmem>>, vector<2x8xf32>
    %cst_7 = arith.constant dense<0.000000e+00> : vector<32x8xf32>
    %5 = tpu.matmul %3, %4, %cst_7 {dimension_numbers = #tpu.dot_dimension_numbers<[1], [0], [0], [1], [0, 0, 1, 1], [], []>} : vector<32x2xf32>, vector<2x8xf32>, vector<32x8xf32> -> vector<32x8xf32>
    %6 = arith.addf %2, %5 : vector<32x8xf32>
    %c0_8 = arith.constant 0 : index
    %c0_9 = arith.constant 0 : index
    %7 = vector.load %arg5[%c0_8, %c0_9] : memref<32x1xf32, #tpu.memory_space<vmem>>, vector<32x1xf32>
    %8 = vector.broadcast %7 : vector<32x1xf32> to vector<32x8xf32>
    %9 = arith.addf %6, %8 : vector<32x8xf32>
    %cst_10 = arith.constant 0.000000e+00 : f32
    %10 = vector.broadcast %cst_10 : f32 to vector<32x8xf32>
    %11 = arith.maximumf %9, %10 : vector<32x8xf32>
    %c0_11 = arith.constant 0 : index
    %c0_12 = arith.constant 0 : index
    %12 = vector.load %arg6[%c0_11, %c0_12] : memref<1x32xf32, #tpu.memory_space<vmem>>, vector<1x32xf32>
    %cst_13 = arith.constant dense<0.000000e+00> : vector<1x8xf32>
    %13 = tpu.matmul %12, %11, %cst_13 {dimension_numbers = #tpu.dot_dimension_numbers<[1], [0], [0], [1], [0, 0, 1, 1], [], []>} : vector<1x32xf32>, vector<32x8xf32>, vector<1x8xf32> -> vector<1x8xf32>
    %c0_14 = arith.constant 0 : index
    %c0_15 = arith.constant 0 : index
    %14 = memref.load %arg7[%c0_14, %c0_15] : memref<1x1xf32, #tpu.memory_space<smem>>
    %15 = vector.broadcast %14 : f32 to vector<1x8xf32>
    %16 = arith.addf %13, %15 : vector<1x8xf32>
    %cst_16 = arith.constant 5.000000e-01 : f32
    %17 = vector.broadcast %cst_16 : f32 to vector<1x8xf32>
    %18 = arith.mulf %17, %16 : vector<1x8xf32>
    %19 = math.tanh %18 : vector<1x8xf32>
    %cst_17 = arith.constant 5.000000e-01 : f32
    %20 = vector.broadcast %cst_17 : f32 to vector<1x8xf32>
    %21 = arith.mulf %20, %19 : vector<1x8xf32>
    %cst_18 = arith.constant 5.000000e-01 : f32
    %22 = vector.broadcast %cst_18 : f32 to vector<1x8xf32>
    %23 = arith.addf %21, %22 : vector<1x8xf32>
    %c0_19 = arith.constant 0 : index
    %c0_20 = arith.constant 0 : index
    %24 = vector.load %arg8[%c0_19, %c0_20] : memref<1x8xf32, #tpu.memory_space<vmem>>, vector<1x8xf32>
    tpu.vector_store %arg8[%c0_19, %c0_20], %23 {strides = array<i32>} : memref<1x8xf32, #tpu.memory_space<vmem>>, vector<1x8xf32>,
    return
  }
  func.func @transform_0(%arg0: i32) -> (i32, i32) {
    %c0_i32 = arith.constant 0 : i32
    %c0_i32_0 = arith.constant 0 : i32
    return %c0_i32, %arg0 : i32, i32
  }
  func.func @transform_1(%arg0: i32) -> (i32, i32) {
    %c0_i32 = arith.constant 0 : i32
    %c0_i32_0 = arith.constant 0 : i32
    return %c0_i32, %arg0 : i32, i32
  }
  func.func @transform_2(%arg0: i32) -> (i32, i32) {
    %c0_i32 = arith.constant 0 : i32
    %c0_i32_0 = arith.constant 0 : i32
    %c0_i32_1 = arith.constant 0 : i32
    return %c0_i32, %c0_i32_0 : i32, i32
  }
  func.func @transform_3(%arg0: i32) -> (i32, i32) {
    %c0_i32 = arith.constant 0 : i32
    %c0_i32_0 = arith.constant 0 : i32
    %c0_i32_1 = arith.constant 0 : i32
    return %c0_i32, %c0_i32_0 : i32, i32
  }
  func.func @transform_4(%arg0: i32) -> (i32, i32) {
    %c0_i32 = arith.constant 0 : i32
    %c0_i32_0 = arith.constant 0 : i32
    %c0_i32_1 = arith.constant 0 : i32
    return %c0_i32, %c0_i32_0 : i32, i32
  }
  func.func @transform_5(%arg0: i32) -> (i32, i32) {
    %c0_i32 = arith.constant 0 : i32
    %c0_i32_0 = arith.constant 0 : i32
    %c0_i32_1 = arith.constant 0 : i32
    return %c0_i32, %c0_i32_0 : i32, i32
  }
  func.func @transform_6(%arg0: i32) -> (i32, i32) {
    %c0_i32 = arith.constant 0 : i32
    %c0_i32_0 = arith.constant 0 : i32
    %c0_i32_1 = arith.constant 0 : i32
    return %c0_i32, %c0_i32_0 : i32, i32
  }
  func.func @transform_7(%arg0: i32) -> (i32, i32) {
    %c0_i32 = arith.constant 0 : i32
    %c0_i32_0 = arith.constant 0 : i32
    return %c0_i32, %arg0 : i32, i32
  }
}

</mosaic_0001>

<bundles_post_ra>
// kernel: tpu_custom_call.1
= control target key start
LH: loop header
LB: loop body
LE: loop exit
PB: predicated region body
PF: predicated region fallthrough
CT: control target
= control target key end

     0   :  { %vm51_vm0 = vcmask 1041408   ;;  %vm38_vm1 = vcmask 15360   ;;  %s555_s0 = inlined_call_operand.vmem [shape: f32[2,8], index: 0, kind: input, shape index: {}]   ;;  %s556_s1 = inlined_call_operand.vmem [shape: f32[2,8], index: 1, kind: input, shape index: {}]   ;;  %s557_s2 = inlined_call_operand.vmem [shape: f32[32,2], index: 2, kind: input, shape index: {}]   ;;  %s558_s3 = inlined_call_operand.vmem [shape: f32[32,2], index: 3, kind: input, shape index: {}]   ;;  %s559_s4 = inlined_call_operand.vmem [shape: f32[32,1], index: 4, kind: input, shape index: {}]   ;;  %s560_s5 = inlined_call_operand.vmem [shape: f32[1,32], index: 5, kind: input, shape index: {}]   ;;  %s561_s6 = inlined_call_operand.<no memory space> [shape: f32[1,1], index: 6, kind: input, shape index: {}]   ;;  %s562_s7 = inlined_call_operand.hbm [shape: f32[1,8], index: 7, kind: output, shape index: {}]  }
   0x1   :  { %v37_v0 = vld [vmem:[%s556_s1] sm:$0x3]  ;;  %v34_v4 = vld [vmem:[%s558_s3 + $0x8] sm:$0xff]  ;;  %v35_v6 = vld [vmem:[%s558_s3 + $0x10] sm:$0xff] }
   0x2   :  { %v32_v1 = vld [vmem:[%s555_s0] sm:$0x3]  ;;  %395 = vmatprep.subr.msk.mxu0 %vm51_vm0, %v37_v0  ;;  %v29_v5 = vld [vmem:[%s557_s2 + $0x8] sm:$0xff]  ;;  %v30_v7 = vld [vmem:[%s557_s2 + $0x10] sm:$0xff] }
   0x3   :  { %v33_v2 = vld [vmem:[%s558_s3] sm:$0xff]  ;;  %403 = vmatprep.subr.msk.mxu1 %vm51_vm0, %v32_v1  ;;  %396 = vmatpush3.msk.msra.mxu0 %vm51_vm0, %v37_v0  ;;  %v243_v8 = vld [vmem:[%s559_s4 + $0x18] sm:$0xff]  ;;  %v241_v9 = vld [vmem:[%s559_s4 + $0x8] sm:$0xff] }
   0x4   :  { %v28_v3 = vld [vmem:[%s557_s2] sm:$0xff]  ;;  %397 = vmatprep.mubr.msk.f32.mxu0 %vm38_vm1, %v33_v2  ;;  %404 = vmatpush3.msk.msra.mxu1 %vm51_vm0, %v32_v1 }
   0x5   :  { %405 = vmatprep.mubr.msk.f32.mxu1 %vm38_vm1, %v28_v3  ;;  %398 = vmatmul.mubr.msk.f32.vlgmr.msra.gmra.mxu0 %vm38_vm1, %v34_v4 }
   0x6   :  { %406 = vmatmul.mubr.msk.f32.vlgmr.msra.gmra.mxu1 %vm38_vm1, %v29_v5 }
   0x7   :  { %13 = vsyncpa [#allocation4], 0  ;;  %400 = vmatprep.mubr.msk.f32.mxu0 %vm38_vm1, %v35_v6  ;;  %408 = vmatprep.mubr.msk.f32.mxu1 %vm38_vm1, %v30_v7  ;;  %v36_v10 = vld [vmem:[%s558_s3 + $0x18] sm:$0xff]  ;;  %v452_v12 = vmov 0   ;;  %v242_v13 = vld [vmem:[%s559_s4 + $0x10] sm:$0xff]  ;;  %v453_v15 = vmov 0.0   ;;  %v274_v41 = vstv %s561_s6 }
   0x8   :  { %v31_v11 = vld [vmem:[%s557_s2 + $0x18] sm:$0xff]  ;;  %427 = vset.pattern.permute.xlu1 %v452_v12  ;;  %426 = vset.pattern.permute.xlu0 %v452_v12  ;;  %v240_v14 = vld [vmem:[%s559_s4] sm:$0xff]  ;;  %vm454_vm2 = vmmov 0   ;;  %vm275_vm3 = vcmask 261120   ;;  %s455_s28 = smov [#allocation3]   ;;  %vm353_vm4 = vcmask 57344  }
   0x9   :  { %261 = vperm.xlu0 %426, %v243_v8   ;;  %251 = vperm.xlu1 %427, %v241_v9   ;;  %v272_v40 = vld [vmem:[%s560_s5] sm:$0x1]  ;;  %s361_s29 = sshll.u32 %s455_s28, 4  ;;  %s362_s29 = int_to_ptr.vmem [resolvable:$true] %s361_s29 }
   0xa   :  { %401 = vmatmul.mubr.msk.f32.gmra.mxu0 %vm38_vm1, %v36_v10  ;;  %409 = vmatmul.mubr.msk.f32.gmra.mxu1 %vm38_vm1, %v31_v11  ;;  %s430_s5 = scalar_lea.vmem %s362_s29, 16  ;;  %s434_s30 = scalar_lea.vmem %s362_s29, 32 }
   0xb   :  { %411 = vmatprep.subr.mxu0 %v453_v15  ;;  %419 = vmatprep.mubr.msk.f32.mxu0 %vm454_vm2, %v453_v15  ;;  %p431_p0 = scmp.ne.s32.totalorder %s362_s29, %s430_s5  ;;  %p435_p1 = scmp.lt.s32.totalorder %s362_s29, %s362_s29 }
   0xc   :  { %p436_p2 = scmp.lt.s32.totalorder %s434_s30, %s430_s5 }
   0xd   :  { %256 = vperm.xlu0 %426, %v242_v13   ;;  %246 = vperm.xlu1 %427, %v240_v14  }
   0xe   :  { %p437_p3 = por %p436_p2, %p435_p1 }
  0x10   :  { %p438_p4 = pnand %p437_p3, %p431_p0 }
  0x84   :  { %v262_v18 = vpop.permute.xlu0 %261  ;;  %v252_v19 = vpop.permute.xlu1 %251 }
  0x88   :  { %v257_v31 = vpop.permute.xlu0 %256  ;;  %v247_v32 = vpop.permute.xlu1 %246 }
  0xc5   :  { %v399_v16 = vpop.f32.mrf.mxu0 }
  0xc6   :  { %v407_v17 = vpop.f32.mrf.mxu1 }
  0xc7   :  { %v121_v20 = vpop.f32.mrf.mxu0  ;;  %v227_v24 = vadd.f32 %v407_v17, %v399_v16 }
  0xc8   :  { %v221_v21 = vpop.f32.mrf.mxu1 }
  0xc9   :  { %v222_v28 = vadd.f32 %v221_v21, %v121_v20  ;;  %v265_v33 = vadd.f32 %v252_v19, %v227_v24 }
  0xca   :  { %v402_v22 = vpop.f32.mrf.mxu0  ;;  %v410_v23 = vpop.f32.mrf.mxu1 }
  0xcb   :  { %v237_v25 = vadd.f32 %v410_v23, %v402_v22  ;;  %v264_v36 = vadd.f32 %v247_v32, %v222_v28  ;;  %v269_v38 = vmax.f32 %v265_v33, 0.0 }
  0xcc   :  { %v131_v26 = vpop.f32.mrf.mxu0  ;;  %v231_v27 = vpop.f32.mrf.mxu1 }
  0xcd   :  { %v267_v29 = vadd.f32 %v262_v18, %v237_v25  ;;  %v232_v30 = vadd.f32 %v231_v27, %v131_v26  ;;  %v268_v39 = vmax.f32 %v264_v36, 0.0 }
  0xcf   :  { %v271_v34 = vmax.f32 %v267_v29, 0.0  ;;  %v266_v35 = vadd.f32 %v257_v31, %v232_v30 }
  0xd1   :  { %v270_v37 = vmax.f32 %v266_v35, 0.0  ;;  %412 = vmatpush3.msra.mxu0 %v271_v34 }
  0xd2   :  { %413 = vmatprep.subr.mxu0 %v453_v15 }
  0xd3   :  { %414 = vmatpush3.msra.mxu0 %v270_v37 }
  0xd4   :  { %415 = vmatprep.subr.mxu0 %v453_v15 }
  0xd5   :  { %416 = vmatpush3.msra.mxu0 %v269_v38 }
  0xd6   :  { %417 = vmatprep.subr.mxu0 %v453_v15 }
  0xd7   :  { %418 = vmatpush3.msra.mxu0 %v268_v39 }
  0xd8   :  { %420 = vmatmul.mubr.msk.f32.vlgmr.msra.gmra.mxu0 %vm275_vm3, %v272_v40 }
 0x198   :  { %v345_v42 = vpop.f32.mrf.mxu0 }
 0x199   :  { %v346_v43 = vadd.f32 %v345_v42, %v274_v41 }
 0x19a   :  { %v421_v44 = vpop.f32.mrf.mxu0 }
 0x19b   :  { %v349_v45 = vmul.f32 0.5, %v346_v43 }
 0x19d   :  { %428 = vtanh.f32 %v349_v45 }
 0x1aa   :  { %v429_v46 = vpop.eup %428 }
 0x1ab   :  { %v351_v47 = vmul.f32 0.5, %v429_v46 }
 0x1ad   :  { %v352_v48 = vadd.f32 0.5, %v351_v47 }
 0x1af   :  { %354 = vst.msk [vmem:[#allocation3] sm:$0x1] %vm353_vm4, %v352_v48 }
 0x1b0   :  { %441 = shalt.err (!%p438_p4)
}
 0x1b1   :  { %364 = dma.vmem_to_hbm [thread:$0]  %s362_s29, 16, %s562_s7, [#allocation4]  }
 0x1b2   :  { %450 = dma.done.wait [#allocation4], 16  }
 0x1b3   :  { %451 = vsyncadd [#allocation4], 4294967280 }
 0x1b4   :  { %368 = vsyncpa [#allocation4], 1 }

</bundles_post_ra>
